<compile_context>
chip_gen: v7x
topology: tpu7x:2x2x1
jax: 0.10.0
libtpu: 0.0.40
codegen_flags: <defaults>
</compile_context>

<pallas_src>
import numpy as np
import jax
import jax.numpy as jnp
from jax import lax
from jax.experimental import pallas as pl
from jax.experimental.pallas import tpu as pltpu


# ------------------------------- Pallas kernel --------------------------------

def _lgquery_kernel(tap_ref, w_ref, b_ref, o_ref):
    # tap_ref: (1, 9*C, TP)  -- taps/channels on sublanes, pixels on lanes
    # w_ref:   (Cout, 9*C)   -- fused (depthwise-conv + pool + 1x1-proj + BN) weight
    # b_ref:   (Cout, 1)     -- fused bias
    taps = tap_ref[0]                                                  # (9*C, TP)
    y = jnp.dot(w_ref[...], taps, preferred_element_type=jnp.float32)  # (Cout, TP)
    y = y + b_ref[...]                                                 # lane broadcast
    o_ref[0] = y.astype(o_ref.dtype)


# --------------------------- parameter folding / prep -------------------------

def _fold_params(params):
    """Fold depthwise conv, pool-add, 1x1 conv bias and BatchNorm into one matmul."""
    dw_w, dw_b, pw_w, pw_b, (gamma, beta, mean, var, eps) = params
    C = dw_w.shape[0]
    Cout = pw_w.shape[0]

    scale = gamma / jnp.sqrt(var + eps)                       # [Cout]
    # avg-pool(kernel=1, stride=2) branch == identity on the centre tap (di=dj=1 -> t=4)
    w_eff = dw_w.reshape(C, 9).at[:, 4].add(1.0)              # [C, 9]
    # W_big[o, t, c] = scale[o] * pw_w[o, c] * w_eff[c, t]
    w_big = (scale[:, None, None] * pw_w[:, None, :]) * jnp.transpose(w_eff)[None, :, :]
    w_big = w_big.reshape(Cout, 9 * C)                        # flat index = t*C + c
    b_total = scale * (pw_w @ dw_b + pw_b - mean) + beta      # [Cout]
    return w_big, b_total.reshape(Cout, 1)


def _pick_tile_p(P, max_tile_p=2048):
    """Pixel-tile size: biggest 128-multiple divisor <= max_tile_p, else full extent."""
    if P <= max_tile_p:
        return P
    for t in range(max_tile_p - max_tile_p % 128, 0, -128):
        if P % t == 0:
            return t
    return P


# --------------------------------- wrapper ------------------------------------

def lgquery_pallas(x_nchw, params):
    B, C, H, W = x_nchw.shape
    _, _, pw_w, _, _ = params
    Cout = pw_w.shape[0]
    Ho = (H - 1) // 2 + 1
    Wo = (W - 1) // 2 + 1
    P = Ho * Wo

    w_big, b_total = _fold_params(params)

    # im2col for the 3x3 / stride-2 / pad-1 window: 9 taps of [B, C, Ho, Wo].
    # Only channel-major NCHW strided slices -- no layout transposes.
    xp = jnp.pad(x_nchw, ((0, 0), (0, 0), (1, 1), (1, 1)))
    taps = []
    for di in range(3):
        for dj in range(3):
            taps.append(xp[:, :,
                           di:di + 2 * (Ho - 1) + 1:2,
                           dj:dj + 2 * (Wo - 1) + 1:2])
    tap = jnp.stack(taps, axis=1).reshape(B, 9 * C, P)   # pixels on the lane axis

    tile_p = _pick_tile_p(P)
    grid = (B, P // tile_p)

    out = pl.pallas_call(
        _lgquery_kernel,
        out_shape=jax.ShapeDtypeStruct((B, Cout, P), jnp.float32),
        grid_spec=pltpu.PrefetchScalarGridSpec(
            num_scalar_prefetch=0,
            grid=grid,
            in_specs=[
                pl.BlockSpec((1, 9 * C, tile_p), lambda b, j: (b, 0, j)),  # taps
                pl.BlockSpec((Cout, 9 * C),      lambda b, j: (0, 0)),     # fused weight
                pl.BlockSpec((Cout, 1),          lambda b, j: (0, 0)),     # fused bias
            ],
            out_specs=pl.BlockSpec((1, Cout, tile_p), lambda b, j: (b, 0, j)),
        ),
        compiler_params=pltpu.CompilerParams(
            dimension_semantics=("parallel", "parallel")),
    )(tap, w_big, b_total)

    return out.reshape(B, Cout, Ho, Wo)


# --------------------------- parameter construction ---------------------------

def make_params(key, in_dim, out_dim, eps=1e-5):
    """Deterministic params mirroring the PyTorch module (Conv2d-style uniform init)."""
    k1, k2, k3, k4 = jax.random.split(key, 4)
    bnd_dw = 1.0 / np.sqrt(9.0)                    # depthwise fan_in = 1*3*3
    dw_w = jax.random.uniform(k1, (in_dim, 3, 3), jnp.float32, -bnd_dw, bnd_dw)
    dw_b = jax.random.uniform(k2, (in_dim,), jnp.float32, -bnd_dw, bnd_dw)
    bnd_pw = 1.0 / np.sqrt(float(in_dim))          # 1x1 conv fan_in = in_dim
    pw_w = jax.random.uniform(k3, (out_dim, in_dim), jnp.float32, -bnd_pw, bnd_pw)
    pw_b = jax.random.uniform(k4, (out_dim,), jnp.float32, -bnd_pw, bnd_pw)
    # BatchNorm2d(out_dim) default init, eval mode.
    gamma = jnp.ones((out_dim,), jnp.float32)
    beta = jnp.zeros((out_dim,), jnp.float32)
    mean = jnp.zeros((out_dim,), jnp.float32)
    var = jnp.ones((out_dim,), jnp.float32)
    return dw_w, dw_b, pw_w, pw_b, (gamma, beta, mean, var, eps)


def lgquery_reference(x, params):
    """Plain-JAX reference of the same forward pass (independent of the fused path)."""
    dw_w, dw_b, pw_w, pw_b, (gamma, beta, mean, var, eps) = params
    B, C, H, W = x.shape
    local = lax.conv_general_dilated(
        x, dw_w.reshape(C, 1, 3, 3),
        window_strides=(2, 2), padding=((1, 1), (1, 1)),
        feature_group_count=C,
        dimension_numbers=("NCHW", "OIHW", "NCHW"))
    local = local + dw_b[None, :, None, None]
    pool = x[:, :, ::2, ::2]                      # AvgPool2d(1, 2, 0)
    q = local + pool
    out = jnp.einsum("oc,bchw->bohw", pw_w, q) + pw_b[None, :, None, None]
    scale = gamma / jnp.sqrt(var + eps)
    shift = beta - mean * scale
    return out * scale[None, :, None, None] + shift[None, :, None, None]


# ----------------------------------- main --------------------------------------

if __name__ == "__main__":
    key = jax.random.PRNGKey(0)
    kx, kp = jax.random.split(key)

    B, Cin, H, W = 2, 4, 16, 16       # input  [B, C, H, W]  (resolution1 = 16)
    Cout = 32                         # out_dim               (resolution2 = 8)

    x = jax.random.normal(kx, (B, Cin, H, W), jnp.float32)
    params = make_params(kp, Cin, Cout)

    out = lgquery_pallas(x, params)
    out = jax.block_until_ready(out)

    ref = lgquery_reference(x, params)
    Ho, Wo = (H - 1) // 2 + 1, (W - 1) // 2 + 1
    assert out.shape == (B, Cout, Ho, Wo)
    np.testing.assert_allclose(np.asarray(out), np.asarray(ref), rtol=1e-4, atol=1e-4)

    print("KERNEL_OK")
</pallas_src>

<mosaic_0001>
module attributes {stable_mosaic.version = 11 : i64} {
  func.func @_lgquery_kernel(%arg0: i32, %arg1: i32, %arg2: memref<1x36x64xf32, #tpu.memory_space<vmem>>, %arg3: memref<32x36xf32, #tpu.memory_space<vmem>>, %arg4: memref<32x1xf32, #tpu.memory_space<vmem>>, %arg5: memref<1x32x64xf32, #tpu.memory_space<vmem>>) attributes {dimension_semantics = [#tpu.dimension_semantics<parallel>, #tpu.dimension_semantics<parallel>], iteration_bounds = array<i64: 2, 1>, scalar_prefetch = 0 : i64, scratch_operands = 0 : i64, tpu.core_type = #tpu.core_type<tc>, window_params = [{transform_indices = @transform_0, window_bounds = array<i64: 1, 36, 64>}, {pipeline_mode = #tpu.pipeline_mode<synchronous>, transform_indices = @transform_1, window_bounds = array<i64: 32, 36>}, {pipeline_mode = #tpu.pipeline_mode<synchronous>, transform_indices = @transform_2, window_bounds = array<i64: 32, 1>}, {transform_indices = @transform_3, window_bounds = array<i64: 1, 32, 64>}]} {
    %c0 = arith.constant 0 : index
    %c0_0 = arith.constant 0 : index
    %c0_1 = arith.constant 0 : index
    %0 = vector.load %arg2[%c0, %c0_0, %c0_1] : memref<1x36x64xf32, #tpu.memory_space<vmem>>, vector<1x36x64xf32>
    %1 = vector.shape_cast %0 : vector<1x36x64xf32> to vector<36x64xf32>
    %c0_2 = arith.constant 0 : index
    %c0_3 = arith.constant 0 : index
    %2 = vector.load %arg3[%c0_2, %c0_3] : memref<32x36xf32, #tpu.memory_space<vmem>>, vector<32x36xf32>
    %cst = arith.constant dense<0.000000e+00> : vector<32x64xf32>
    %3 = tpu.matmul %2, %1, %cst {dimension_numbers = #tpu.dot_dimension_numbers<[1], [0], [0], [1], [0, 0, 1, 1], [], []>} : vector<32x36xf32>, vector<36x64xf32>, vector<32x64xf32> -> vector<32x64xf32>
    %c0_4 = arith.constant 0 : index
    %c0_5 = arith.constant 0 : index
    %4 = vector.load %arg4[%c0_4, %c0_5] : memref<32x1xf32, #tpu.memory_space<vmem>>, vector<32x1xf32>
    %5 = vector.broadcast %4 : vector<32x1xf32> to vector<32x64xf32>
    %6 = arith.addf %3, %5 : vector<32x64xf32>
    %c0_6 = arith.constant 0 : index
    %c0_7 = arith.constant 0 : index
    %c0_8 = arith.constant 0 : index
    %7 = vector.load %arg5[%c0_6, %c0_7, %c0_8] : memref<1x32x64xf32, #tpu.memory_space<vmem>>, vector<1x32x64xf32>
    %8 = vector.shape_cast %7 : vector<1x32x64xf32> to vector<32x64xf32>
    %9 = vector.shape_cast %6 : vector<32x64xf32> to vector<1x32x64xf32>
    tpu.vector_store %arg5[%c0_6, %c0_7, %c0_8], %9 {strides = array<i32>} : memref<1x32x64xf32, #tpu.memory_space<vmem>>, vector<1x32x64xf32>,
    return
  }
  func.func @transform_0(%arg0: i32, %arg1: i32) -> (i32, i32, i32) {
    %c0_i32 = arith.constant 0 : i32
    %c0_i32_0 = arith.constant 0 : i32
    return %arg0, %c0_i32, %arg1 : i32, i32, i32
  }
  func.func @transform_1(%arg0: i32, %arg1: i32) -> (i32, i32) {
    %c0_i32 = arith.constant 0 : i32
    %c0_i32_0 = arith.constant 0 : i32
    %c0_i32_1 = arith.constant 0 : i32
    return %c0_i32, %c0_i32_0 : i32, i32
  }
  func.func @transform_2(%arg0: i32, %arg1: i32) -> (i32, i32) {
    %c0_i32 = arith.constant 0 : i32
    %c0_i32_0 = arith.constant 0 : i32
    %c0_i32_1 = arith.constant 0 : i32
    return %c0_i32, %c0_i32_0 : i32, i32
  }
  func.func @transform_3(%arg0: i32, %arg1: i32) -> (i32, i32, i32) {
    %c0_i32 = arith.constant 0 : i32
    %c0_i32_0 = arith.constant 0 : i32
    return %arg0, %c0_i32, %arg1 : i32, i32, i32
  }
}

</mosaic_0001>

<bundles_post_ra>
// kernel: tpu_custom_call.1
= control target key start
LH: loop header
LB: loop body
LE: loop exit
PB: predicated region body
PF: predicated region fallthrough
CT: control target
= control target key end

     0   :  { %8 = vsyncpa [#allocation3], 0  ;;  %s792_s0 = inlined_call_operand.vmem [shape: f32[2,36,64], index: 0, kind: input, shape index: {}]   ;;  %s793_s1 = inlined_call_operand.vmem [shape: f32[32,36], index: 1, kind: input, shape index: {}]   ;;  %s794_s2 = inlined_call_operand.vmem [shape: f32[32,1], index: 2, kind: input, shape index: {}]   ;;  %s795_s3 = inlined_call_operand.hbm [shape: f32[2,32,64], index: 3, kind: output, shape index: {}]  }
   0x1   :  { %10 = vsyncpa [#allocation3 + $0x1], 0  ;;  %s649_s12 = smov 0   ;;  %s651_s13 = smov 0  }
   0x2   :  { %s653_s14 = smov 0   ;;  %s655_s15 = smov 0  }
   0x3   :  { %s657_s16 = smov 0   ;;  %s659_s17 = smov 0  }
   0x4 LB: > { %s427_s18 = sadd.s32 4294967295, %s623_s17   ;;  %s428_s19 = sadd.s32 4294967294, %s623_s17   ;;  %s623_s17 = sphi %s659_s17, %s16_s17   ;;  %s619_s16 = sphi %s657_s16, %s802_s16   ;;  %s615_s15 = sphi %s655_s15, %s801_s15   ;;  %s611_s14 = sphi %s653_s14, %s800_s14   ;;  %s607_s13 = sphi %s651_s13, %s799_s13   ;;  %s603_s12 = sphi %s649_s12, %s798_s12  }
   0x5   : > { %s28_s20 = sadd.s32 1, %s619_s16  ;;  %s107_s21 = sadd.s32 1, %s611_s14 }
   0x6   : > { %p30_p0 = scmp.ge.s32.totalorder %s28_s20, 2  ;;  %p117_p1 = scmp.ne.s32.totalorder %s611_s14, %s607_s13 }
   0x7   : > { %p118_p2 = scmp.eq.s32.totalorder %s427_s18, 1  ;;  %p123_p3 = scmp.ne.s32.totalorder %s607_s13, %s603_s12 }
   0x8   : > { %s804_s20 = smov (%p30_p0, %s28_s20), 0  ;;  %p124_p5 = scmp.eq.s32.totalorder %s428_s19, 1 }
   0x9   : > { %p689_p4 = por %p118_p2, %p117_p1  ;;  %s102_s23 = ssub.s32 %s619_s16, %s804_s20 }
   0xa   : > { %p431_p6 = scmp.ge.s32.totalorder %s623_s17, 1  ;;  %p105_p7 = scmp.eq.s32.totalorder %s102_s23, 0 }
   0xb   : > { %p696_p8 = por %p124_p5, %p123_p3  ;;  %p159_p9 = scmp.lt.s32.totalorder %s623_s17, 3 }
   0xc   : > { %s702_s25 = scalar_select %p105_p7, %s611_s14, %s107_s21  }
   0xd   : > { %p160_p10 = pnand %p431_p6, %p159_p9 }
   0xe   : > { %p186_p11 = scmp.lt.s32.totalorder (!%p160_p10), %s615_s15, 1  ;;  %v199_v0 = vld [vmem:[%s793_s1] sm:$0xff] (!%p160_p10)  ;;  %vm227_vm0 = vcmask (!%p160_p10), 293888   ;;  %v201_v1 = vld [vmem:[%s793_s1 + $0x10] sm:$0xff] (!%p160_p10)  ;;  %v625_v4 = vmov (!%p160_p10), 0   ;;  %v206_v5 = vld [vmem:[%s794_s2 + $0x18] sm:$0xff] (!%p160_p10) }
   0xf   : > { %163 = sbr.rel (%p160_p10) target bundleno = 270 (0x10e), region = 32  ;;  %464 = vmatprep.mubr.msk.f32.mxu0 (!%p160_p10), %vm227_vm0, %v199_v0  ;;  %467 = vmatprep.mubr.msk.f32.mxu1 (!%p160_p10), %vm227_vm0, %v201_v1  ;;  %v205_v2 = vld [vmem:[%s794_s2 + $0x10] sm:$0xff] (!%p160_p10)  ;;  %v203_v3 = vld [vmem:[%s794_s2] sm:$0xff] (!%p160_p10)  ;;  %v204_v6 = vld [vmem:[%s794_s2 + $0x8] sm:$0xff] (!%p160_p10)  ;;  %vm240_vm1 = vcmask (!%p160_p10), 1043456   ;;  %s183_s30 = sand.u32 (!%p160_p10), 1, %s607_s13  }
  0x10   : > { %544 = vset.pattern.permute.xlu1 (!%p160_p10), %v625_v4  ;;  %543 = vset.pattern.permute.xlu0 (!%p160_p10), %v625_v4  ;;  %v200_v14 = vld [vmem:[%s793_s1 + $0x8] sm:$0xff] (!%p160_p10)  ;;  %v202_v15 = vld [vmem:[%s793_s1 + $0x18] sm:$0xff] (!%p160_p10)  ;;  %s432_s4 = sshll.u32 (!%p160_p10), %s183_s30, 5  ;;  %vm329_vm2 = vcmask (!%p160_p10), 523264   ;;  %s626_s18 = smov (!%p160_p10), [#allocation2]  }
  0x11   : > { %219 = vperm.xlu1 (!%p160_p10), %544, %v205_v2   ;;  %209 = vperm.xlu0 (!%p160_p10), %543, %v203_v3   ;;  %s185_s5 = scalar_lea.vmem (!%p160_p10), [#allocation2], %s432_s4  ;;  %s549_s19 = sshll.u32 (!%p160_p10), %s626_s18, 4  ;;  %s550_s19 = int_to_ptr.vmem [resolvable:$false] %s549_s19 }
  0x12   : > { %s349_s6 = sshll.u32 (!%p160_p10), %s185_s5, 4  ;;  %s551_s21 = scalar_lea.vmem (!%p160_p10), %s550_s19, 1024  ;;  %s739_s6 = int_to_ptr.vmem [resolvable:$true] %s349_s6 }
  0x13   : > { %s545_s11 = scalar_lea.vmem (!%p160_p10), %s739_s6, 512  ;;  %p552_p1 = scmp.lt.s32.totalorder (!%p160_p10), %s739_s6, %s550_s19 }
  0x14   : > { %p546_p12 = scmp.ne.s32.totalorder (!%p160_p10), %s739_s6, %s545_s11  ;;  %p553_p2 = scmp.lt.s32.totalorder (!%p160_p10), %s551_s21, %s545_s11 }
  0x15   : > { %224 = vperm.xlu1 (!%p160_p10), %544, %v206_v5   ;;  %214 = vperm.xlu0 (!%p160_p10), %543, %v204_v6  }
  0x16   : > { %s187_s7 = scalar_select %p186_p11, %s615_s15, 1 }
  0x17   : > { %p547_p13 = pnand %p546_p12, %p689_p4  ;;  %p554_p3 = por %p553_p2, %p552_p1 }
  0x18   : > { %s484_s8 = smul.u32 40, %s187_s7  ;;  %s444_s7 = sshll.u32 %s615_s15, 9 }
  0x19   : > { %s744_s10 = scalar_lea.hbm %s795_s3, %s444_s7  ;;  %s746_s15 = scalar_lea.sflag [#allocation3], %s183_s30 }
  0x1a   : > { %s193_s23 = scalar_lea.vmem %s792_s0, %s484_s8  ;;  %p548_p0 = pneg %p547_p13 }
  0x1b   : > { %v194_v7 = vld [vmem:[%s193_s23] sm:$0xff]  ;;  %v195_v8 = vld [vmem:[%s193_s23 + $0x8] sm:$0xff]  ;;  %v196_v9 = vld [vmem:[%s193_s23 + $0x10] sm:$0xff] }
  0x1c   : > { %v470_v10 = vpack.c.bf16 %v195_v8, %v194_v7  ;;  %v197_v11 = vld [vmem:[%s193_s23 + $0x18] sm:$0xff]  ;;  %v198_v13 = vld [vmem:[%s193_s23 + $0x20] sm:$0xf]  ;;  %p555_p5 = pnand %p554_p3, %p548_p0 }
  0x1d   : > { %v474_v12 = vpack.c.bf16 %v197_v11, %v196_v9 }
  0x1e   : > { %471 = vmatprep.subr.bf16.mxu0 %v470_v10  ;;  %478 = vmatprep.subr.bf16.mxu1 %v470_v10 }
  0x1f   : > { %473 = vmatpush3.bf16.msra.mxu0 %v470_v10  ;;  %481 = vmatpush3.bf16.msra.mxu1 %v470_v10 }
  0x20   : > { %475 = vmatprep.subr.bf16.mxu0 %v474_v12  ;;  %479 = vmatprep.subr.bf16.mxu1 %v474_v12 }
  0x23   : > { %477 = vmatpush3.bf16.msra.mxu0 %v474_v12  ;;  %482 = vmatpush3.bf16.msra.mxu1 %v474_v12 }
  0x24   : > { %462 = vmatprep.subr.msk.mxu0 %vm240_vm1, %v198_v13  ;;  %480 = vmatprep.subr.msk.mxu1 %vm240_vm1, %v198_v13 }
  0x27   : > { %463 = vmatpush3.msk.msra.mxu0 %vm240_vm1, %v198_v13  ;;  %483 = vmatpush3.msk.msra.mxu1 %vm240_vm1, %v198_v13 }
  0x28   : > { %465 = vmatmul.mubr.msk.f32.vlgmr.msra.gmra.mrb[0].mxu0 %vm227_vm0, %v200_v14  ;;  %468 = vmatmul.mubr.msk.f32.vlgmr.msra.gmra.mrb[0].mxu1 %vm227_vm0, %v202_v15 }
  0x90   : > { %v220_v16 = vpop.permute.xlu1 %219  ;;  %v210_v17 = vpop.permute.xlu0 %209 }
  0x94   : > { %v225_v18 = vpop.permute.xlu1 %224  ;;  %v215_v19 = vpop.permute.xlu0 %214 }
  0xfb   : > { %v466_v20 = vpop.f32.mrb[0].mxu0  ;;  %v469_v21 = vpop.f32.mrb[0].mxu1 }
  0xfc   : > { %v316_v22 = vadd.f32 %v466_v20, %v215_v19  ;;  %v326_v23 = vadd.f32 %v469_v21, %v225_v18  ;;  %v310_v24 = vpop.f32.mrb[1].mxu0  ;;  %v320_v25 = vpop.f32.mrb[1].mxu1 }
  0xfd   : > { %v311_v26 = vadd.f32 %v310_v24, %v210_v17  ;;  %v321_v27 = vadd.f32 %v320_v25, %v220_v16 }
  0xfe   : > { %331 = vst.msk [vmem:[%s185_s5 + $0x8] sm:$0xff] %vm329_vm2, %v316_v22  ;;  %333 = vst.msk [vmem:[%s185_s5 + $0x18] sm:$0xff] %vm329_vm2, %v326_v23 }
  0xff   : > { %330 = vst.msk [vmem:[%s185_s5] sm:$0xff] %vm329_vm2, %v311_v26  ;;  %332 = vst.msk [vmem:[%s185_s5 + $0x10] sm:$0xff] %vm329_vm2, %v321_v27 }
 0x100   : > { %558 = shalt.err (!%p555_p5)
}
 0x101   : > { %s559_s23 = scalar_lea.hbm %s744_s10, 512  ;;  %s563_s28 = scalar_lea.hbm %s795_s3, 1024 }
 0x102   : > { %p560_p6 = scmp.ne.s32.totalorder %s744_s10, %s559_s23  ;;  %p564_p10 = scmp.lt.u32.totalorder %s744_s10, %s795_s3 }
 0x103   : > { %p565_p11 = scmp.lt.u32.totalorder %s563_s28, %s559_s23  ;;  %p567_p13 = scmp.lt.u32.totalorder %s559_s23, %s744_s10 }
 0x104   : > { %p561_p7 = pnand %p560_p6, %p689_p4 }
 0x105   : > { %p566_p12 = por %p565_p11, %p564_p10 }
 0x106   : > { %p562_p9 = pneg %p561_p7 }
 0x107   : > { %p568_p0 = por %p567_p13, %p566_p12 }
 0x109   : > { %p569_p1 = pnand %p568_p0, %p562_p9 }
 0x10b   : > { %572 = shalt.err (!%p569_p1)
}
 0x10c   : > { %s627_s4 = smov 128   ;;  %s628_s5 = smov 8  }
 0x10d   : > { %485 = dma.vmem_to_hbm [thread:$0]  (%p689_p4), %s739_s6, 512, %s744_s10, %s746_s15, %s627_s4, %s627_s4, %s628_s5  }
 0x10e PF: > { %p491_p2 = scmp.ge.s32.totalorder %s623_s17, 2  ;;  %s364_s7 = sand.u32 1, %s603_s12  }
 0x10f   : > { %s365_s8 = scalar_lea.sflag [#allocation3], %s364_s7 }
 0x110   : > { %p488_p3 = pnand %p491_p2, %p696_p8 }
 0x112   : > { %598 = dma.done.wait (!%p488_p3), %s365_s8, 512  }
 0x113   : > { %600 = vsyncadd (!%p488_p3), %s365_s8, 4294966784  ;;  %s16_s17 = sadd.s32 1, %s623_s17   ;;  %s798_s12 = smov %s607_s13 }
 0x114   : > { %p13_p5 = scmp.ge.s32.totalorder %s16_s17, 4   ;;  %s799_s13 = smov %s611_s14 }
 0x115   : > { %s800_s14 = smov %s702_s25  ;;  %s801_s15 = smov %s619_s16 }
 0x116   : > { %s802_s16 = smov %s804_s20  ;;  %15 = sbr.rel (!%p13_p5) target bundleno = 4 (0x4), region = 67 }
 0x11d   :  { %370 = vsyncpa [#allocation3], 1 }
 0x11e   :  { %372 = vsyncpa [#allocation3 + $0x1], 1 }

</bundles_post_ra>
